<compile_context>
chip_gen: v7x
topology: tpu7x:2x2x1
jax: 0.10.0
libtpu: 0.0.40
codegen_flags: <defaults>
</compile_context>

<pallas_src>
import functools

import jax
import jax.numpy as jnp
from jax.experimental import pallas as pl
from jax.experimental.pallas import tpu as pltpu

LANE = 128          # feature dims padded to multiples of this (lane width)
BATCH_ALIGN = 16    # batch tiles padded to multiples of this (bf16 sublane pack)
_NEG_BIG = -1e30


def _round_up(x, m):
    return (x + m - 1) // m * m


def _cdiv(a, b):
    return -(-a // b)


# ---------------------------------------------------------------------------
# Activations (fused). Mirrors the PyTorch ACTIVATIONS dict; softmax/logsoftmax
# use dim=1 as in ACTIVATION_DEFAULT_KWARGS. `true_dim` = unpadded feature
# width so the dim=1 reductions ignore zero-padded lanes.
# ---------------------------------------------------------------------------
def _apply_act(y, act, true_dim):
    if act in ("none", None):
        return y
    if act == "relu":
        return jnp.maximum(y, 0.0)
    if act == "tanh":
        return jnp.tanh(y)
    if act == "sigmoid":
        # one EUP op (tanh) + cheap VPU math instead of exp + reciprocal.
        return 0.5 * jnp.tanh(0.5 * y) + 0.5
    if act == "lrelu":  # nn.LeakyReLU default negative_slope=0.01
        return jnp.maximum(y, 0.01 * y)   # single VPU max
    if act in ("softmax", "logsoftmax"):
        d_pad = y.shape[-1]
        needs_mask = d_pad != true_dim
        if needs_mask:
            lane = jax.lax.broadcasted_iota(jnp.int32, y.shape, y.ndim - 1)
            valid = lane < true_dim
            y = jnp.where(valid, y, _NEG_BIG)
        m = jnp.max(y, axis=-1, keepdims=True)
        s = y - m
        e = jnp.exp(s)
        denom = jnp.sum(e, axis=-1, keepdims=True)
        if act == "softmax":
            out = e * pl.reciprocal(denom, approx=True)
        else:  # logsoftmax
            out = s - jnp.log(denom)
        if needs_mask:
            # keep padded lanes finite (0) so the next layer's zero weight
            # rows don't produce 0 * inf = NaN.
            out = jnp.where(valid, out, 0.0)
        return out
    raise ValueError(f"unknown activation: {act}")


# ---------------------------------------------------------------------------
# Fused MLP kernel: refs = (x, w0, b0, w1, b1, ..., out).
# x and the inter-layer carry are bf16; bias/activation math in f32; only the
# final output is stored (f32).
# ---------------------------------------------------------------------------
def mlp_kernel(*refs, acts, true_dims):
    x_ref = refs[0]
    o_ref = refs[-1]
    wb = refs[1:-1]
    n_layers = len(acts)

    h = x_ref[...]                              # bf16 (TM, d0_pad)
    for i, act in enumerate(acts):
        w = wb[2 * i][...]                      # bf16 (d_in_pad, d_out_pad)
        b = wb[2 * i + 1][...]                  # f32  (1, d_out_pad)
        y = jnp.dot(h, w, preferred_element_type=jnp.float32)   # MXU, f32 acc
        y = _apply_act(y + b, act, true_dims[i])                 # f32 math
        # carry inter-layer activations in bf16 (halves live footprint and
        # feeds the next MXU pass directly); keep the last layer f32.
        h = y.astype(jnp.bfloat16) if i + 1 < n_layers else y
    o_ref[...] = h.astype(o_ref.dtype)


# ---------------------------------------------------------------------------
# Tiling choice: None => grid-less single call for tiny batches; otherwise
# >=2 tiles (even count) so dimension_semantics=('parallel',) can split work
# across both v7x TensorCores, TM rounded to the bf16 sublane pack.
# ---------------------------------------------------------------------------
def _choose_tiling(N, tm_max):
    if N <= 2 * BATCH_ALIGN:
        return None, 1
    nt = max(2, _cdiv(N, tm_max))
    if nt % 2:
        nt += 1
    TM = _round_up(_cdiv(N, nt), BATCH_ALIGN)
    nt = _cdiv(N, TM)
    return TM, nt


# ---------------------------------------------------------------------------
# Wrapper: pads features/batch, casts x to bf16, builds grid & BlockSpecs,
# sets VMEM budget + cost estimate, slices the result.
# ---------------------------------------------------------------------------
def mlp_forward(x, kernel_params, nonlins, dims, *, tm_max=512):
    N, d_in = x.shape
    d0p = kernel_params[0][0].shape[0]      # padded input feature dim
    dLp = kernel_params[-1][0].shape[1]     # padded output feature dim

    # Pad features to lane-dense width and cast the streamed tile to bf16
    # (halves x HBM->VMEM DMA bytes and the x double/triple buffer VMEM).
    if d0p != d_in:
        x = jnp.pad(x, ((0, 0), (0, d0p - d_in)))
    x = x.astype(jnp.bfloat16)

    TM, num_tiles = _choose_tiling(N, tm_max)
    if TM is None:
        TM = _round_up(N, BATCH_ALIGN)
    Np = num_tiles * TM
    if Np != N:
        x = jnp.pad(x, ((0, Np - N), (0, 0)))

    flat_inputs = [x]
    for w, b in kernel_params:
        flat_inputs += [w, b]

    kernel = functools.partial(
        mlp_kernel, acts=tuple(nonlins), true_dims=tuple(dims))
    out_shape = jax.ShapeDtypeStruct((Np, dLp), jnp.float32)

    # --- explicit VMEM budget (weights single-buffered, x 3-deep, out 2-deep)
    weight_bytes = sum(w.size * w.dtype.itemsize + b.size * b.dtype.itemsize
                       for w, b in kernel_params)
    max_dp = max([d0p] + [w.shape[1] for w, _ in kernel_params])
    stream_bytes = 3 * TM * d0p * 2 + 2 * TM * dLp * 4
    scratch_bytes = 3 * TM * max_dp * 4         # live activation slabs
    vmem_est = weight_bytes + stream_bytes + scratch_bytes
    vmem_limit = min(max(int(vmem_est * 1.5) + (4 << 20), 32 << 20), 100 << 20)
    # TODO(synk): if weight_bytes > ~48 MiB, keep-all-weights-resident does not
    # fit v7x VMEM; add a K/N-tiled weight path (3-axis grid + accumulator).

    # --- advisory cost estimate for XLA scheduling ---------------------------
    flops = 2 * Np * sum(w.shape[0] * w.shape[1] for w, _ in kernel_params)
    trans = 0
    for act, (w, _) in zip(nonlins, kernel_params):
        if act in ("tanh", "sigmoid", "softmax", "logsoftmax"):
            trans += Np * w.shape[1]
    bytes_acc = x.size * x.dtype.itemsize + weight_bytes + Np * dLp * 4
    cost = pl.CostEstimate(flops=flops, transcendentals=trans,
                           bytes_accessed=bytes_acc)

    if num_tiles == 1:
        # Tiny batch: single grid-less invocation, full arrays in VMEM.
        out = pl.pallas_call(
            kernel,
            out_shape=out_shape,
            compiler_params=pltpu.CompilerParams(vmem_limit_bytes=vmem_limit),
            cost_estimate=cost,
        )(*flat_inputs)
    else:
        # Gridded path: stream batch tiles (deeper buffering), keep weights
        # resident and SINGLE-buffered (constant index_map -> no re-fetch).
        x_depth = pl.Buffered(3 if num_tiles >= 3 else 2)
        in_specs = [pl.BlockSpec((TM, d0p), lambda i: (i, 0),
                                 pipeline_mode=x_depth)]
        for w, b in kernel_params:
            in_specs.append(pl.BlockSpec(w.shape, lambda i: (0, 0),
                                         pipeline_mode=pl.Buffered(1)))
            in_specs.append(pl.BlockSpec(b.shape, lambda i: (0, 0),
                                         pipeline_mode=pl.Buffered(1)))
        out_specs = pl.BlockSpec((TM, dLp), lambda i: (i, 0))
        out = pl.pallas_call(
            kernel,
            out_shape=out_shape,
            grid=(num_tiles,),
            in_specs=in_specs,
            out_specs=out_specs,
            compiler_params=pltpu.CompilerParams(
                dimension_semantics=("parallel",),
                vmem_limit_bytes=vmem_limit),
            cost_estimate=cost,
        )(*flat_inputs)

    # Slice back to true batch / true output width outside the kernel.
    return out[:N, :dims[-1]]


# ---------------------------------------------------------------------------
# MLP: mirrors the PyTorch module ((Linear -> activation) * L). Parameters
# initialized with nn.Linear's default fan_in uniform bound. Kernel copies are
# zero-padded to lane-dense widths; weights stored in bf16 (MXU-fast), biases
# kept in f32. Unpadded f32 copies retained for the pure-JAX reference.
# ---------------------------------------------------------------------------
class MLP:
    def __init__(self, in_dim, dims, nonlins, key):
        assert len(nonlins) == len(dims)
        self.in_dim = in_dim
        self.out_dim = dims[-1]
        self.dims = list(dims)
        self.nonlins = list(nonlins)

        sizes = [in_dim] + list(dims)
        padded = [_round_up(s, LANE) for s in sizes]

        self.params = []         # (w f32 (fan_in, fan_out), b f32 (fan_out,))
        self.kernel_params = []  # (w bf16 padded, b f32 padded (1, d_out_pad))
        for i in range(len(dims)):
            fan_in, fan_out = sizes[i], sizes[i + 1]
            key, kw, kb = jax.random.split(key, 3)
            bound = 1.0 / float(fan_in) ** 0.5
            w = jax.random.uniform(kw, (fan_in, fan_out), jnp.float32, -bound, bound)
            b = jax.random.uniform(kb, (fan_out,), jnp.float32, -bound, bound)
            self.params.append((w, b))

            wp = jnp.zeros((padded[i], padded[i + 1]), jnp.float32)
            wp = wp.at[:fan_in, :fan_out].set(w).astype(jnp.bfloat16)
            bp = jnp.zeros((1, padded[i + 1]), jnp.float32)
            bp = bp.at[0, :fan_out].set(b)
            self.kernel_params.append((wp, bp))

    def __call__(self, x):
        return mlp_forward(x, self.kernel_params, self.nonlins, self.dims)

    def reference(self, x):
        """Pure-JAX f32 reference (unpadded weights) for correctness checks."""
        for (w, b), act in zip(self.params, self.nonlins):
            y = x @ w + b
            if act in ("none", None):
                x = y
            elif act == "relu":
                x = jnp.maximum(y, 0.0)
            elif act == "tanh":
                x = jnp.tanh(y)
            elif act == "sigmoid":
                x = jax.nn.sigmoid(y)
            elif act == "lrelu":
                x = jnp.where(y >= 0.0, y, 0.01 * y)
            elif act == "softmax":
                x = jax.nn.softmax(y, axis=1)
            elif act == "logsoftmax":
                x = jax.nn.log_softmax(y, axis=1)
            else:
                raise ValueError(act)
        return x


if __name__ == "__main__":
    key = jax.random.PRNGKey(0)

    in_dim = 32
    dims = [64, 32, 10]
    configs = [
        ["relu", "tanh", "none"],
        ["lrelu", "logsoftmax", "softmax"],   # exercises masked dim=1 paths
        ["sigmoid", "relu", "none"],          # exercises the tanh-based sigmoid
    ]
    # N=8 hits the grid-less path; N=192 hits the gridded (Buffered) path.
    batch_sizes = [8, 192]

    for nonlins in configs:
        key, km = jax.random.split(key)
        model = MLP(in_dim, dims, nonlins, km)
        for N in batch_sizes:
            key, kx = jax.random.split(key)
            x = jax.random.normal(kx, (N, in_dim), jnp.float32)

            out = jax.block_until_ready(model(x))
            ref = model.reference(x)

            assert out.shape == (N, dims[-1])
            # bf16 weights + bf16 streamed x / inter-layer carry (f32 accumulate)
            # -> loosened tolerance vs the f32 reference.
            assert jnp.allclose(out, ref, atol=4e-2, rtol=4e-2), \
                f"mismatch vs reference for nonlins={nonlins}, N={N}"

    print("KERNEL_OK")
</pallas_src>

<mosaic_0001>
module attributes {stable_mosaic.version = 11 : i64} {
  func.func @mlp_kernel(%arg0: memref<16x128xbf16, #tpu.memory_space<vmem>>, %arg1: memref<128x128xbf16, #tpu.memory_space<vmem>>, %arg2: memref<1x128xf32, #tpu.memory_space<vmem>>, %arg3: memref<128x128xbf16, #tpu.memory_space<vmem>>, %arg4: memref<1x128xf32, #tpu.memory_space<vmem>>, %arg5: memref<128x128xbf16, #tpu.memory_space<vmem>>, %arg6: memref<1x128xf32, #tpu.memory_space<vmem>>, %arg7: memref<16x128xf32, #tpu.memory_space<vmem>>) attributes {dimension_semantics = [], scalar_prefetch = 0 : i64, scratch_operands = 0 : i64, tpu.core_type = #tpu.core_type<tc>} {
    %c0 = arith.constant 0 : index
    %c0_0 = arith.constant 0 : index
    %0 = vector.load %arg0[%c0, %c0_0] : memref<16x128xbf16, #tpu.memory_space<vmem>>, vector<16x128xbf16>
    %c0_1 = arith.constant 0 : index
    %c0_2 = arith.constant 0 : index
    %1 = vector.load %arg1[%c0_1, %c0_2] : memref<128x128xbf16, #tpu.memory_space<vmem>>, vector<128x128xbf16>
    %c0_3 = arith.constant 0 : index
    %c0_4 = arith.constant 0 : index
    %2 = vector.load %arg2[%c0_3, %c0_4] : memref<1x128xf32, #tpu.memory_space<vmem>>, vector<1x128xf32>
    %cst = arith.constant dense<0.000000e+00> : vector<16x128xf32>
    %3 = tpu.matmul %0, %1, %cst {dimension_numbers = #tpu.dot_dimension_numbers<[1], [0], [0], [1], [0, 0, 1, 1], [], []>} : vector<16x128xbf16>, vector<128x128xbf16>, vector<16x128xf32> -> vector<16x128xf32>
    %4 = vector.broadcast %2 : vector<1x128xf32> to vector<16x128xf32>
    %5 = arith.addf %3, %4 : vector<16x128xf32>
    %cst_5 = arith.constant 0.000000e+00 : f32
    %6 = vector.broadcast %cst_5 : f32 to vector<16x128xf32>
    %7 = arith.maximumf %5, %6 : vector<16x128xf32>
    %8 = arith.truncf %7 : vector<16x128xf32> to vector<16x128xbf16>
    %c0_6 = arith.constant 0 : index
    %c0_7 = arith.constant 0 : index
    %9 = vector.load %arg3[%c0_6, %c0_7] : memref<128x128xbf16, #tpu.memory_space<vmem>>, vector<128x128xbf16>
    %c0_8 = arith.constant 0 : index
    %c0_9 = arith.constant 0 : index
    %10 = vector.load %arg4[%c0_8, %c0_9] : memref<1x128xf32, #tpu.memory_space<vmem>>, vector<1x128xf32>
    %cst_10 = arith.constant dense<0.000000e+00> : vector<16x128xf32>
    %11 = tpu.matmul %8, %9, %cst_10 {dimension_numbers = #tpu.dot_dimension_numbers<[1], [0], [0], [1], [0, 0, 1, 1], [], []>} : vector<16x128xbf16>, vector<128x128xbf16>, vector<16x128xf32> -> vector<16x128xf32>
    %12 = vector.broadcast %10 : vector<1x128xf32> to vector<16x128xf32>
    %13 = arith.addf %11, %12 : vector<16x128xf32>
    %14 = math.tanh %13 : vector<16x128xf32>
    %15 = arith.truncf %14 : vector<16x128xf32> to vector<16x128xbf16>
    %c0_11 = arith.constant 0 : index
    %c0_12 = arith.constant 0 : index
    %16 = vector.load %arg5[%c0_11, %c0_12] : memref<128x128xbf16, #tpu.memory_space<vmem>>, vector<128x128xbf16>
    %c0_13 = arith.constant 0 : index
    %c0_14 = arith.constant 0 : index
    %17 = vector.load %arg6[%c0_13, %c0_14] : memref<1x128xf32, #tpu.memory_space<vmem>>, vector<1x128xf32>
    %cst_15 = arith.constant dense<0.000000e+00> : vector<16x128xf32>
    %18 = tpu.matmul %15, %16, %cst_15 {dimension_numbers = #tpu.dot_dimension_numbers<[1], [0], [0], [1], [0, 0, 1, 1], [], []>} : vector<16x128xbf16>, vector<128x128xbf16>, vector<16x128xf32> -> vector<16x128xf32>
    %19 = vector.broadcast %17 : vector<1x128xf32> to vector<16x128xf32>
    %20 = arith.addf %18, %19 : vector<16x128xf32>
    %c0_16 = arith.constant 0 : index
    %c0_17 = arith.constant 0 : index
    %21 = vector.load %arg7[%c0_16, %c0_17] : memref<16x128xf32, #tpu.memory_space<vmem>>, vector<16x128xf32>
    tpu.vector_store %arg7[%c0_16, %c0_17], %20 {strides = array<i32>} : memref<16x128xf32, #tpu.memory_space<vmem>>, vector<16x128xf32>,
    return
  }
}

</mosaic_0001>

<bundles_post_ra>
// kernel: tpu_custom_call.1
= control target key start
LH: loop header
LB: loop body
LE: loop exit
PB: predicated region body
PF: predicated region fallthrough
CT: control target
= control target key end

     0   :  { %12 = vsyncpa [#allocation3], 0  ;;  %s903_s0 = inlined_call_operand.hbm [shape: bf16[16,128], index: 0, kind: input, shape index: {}]   ;;  %s904_s1 = inlined_call_operand.hbm [shape: bf16[128,128], index: 1, kind: input, shape index: {}]   ;;  %s905_s2 = inlined_call_operand.vmem [shape: f32[1,128], index: 2, kind: input, shape index: {}]   ;;  %s906_s3 = inlined_call_operand.hbm [shape: bf16[128,128], index: 3, kind: input, shape index: {}]   ;;  %s907_s4 = inlined_call_operand.vmem [shape: f32[1,128], index: 4, kind: input, shape index: {}]   ;;  %s908_s5 = inlined_call_operand.hbm [shape: bf16[128,128], index: 5, kind: input, shape index: {}]   ;;  %s909_s6 = inlined_call_operand.vmem [shape: f32[1,128], index: 6, kind: input, shape index: {}]   ;;  %s910_s7 = inlined_call_operand.hbm [shape: f32[16,128], index: 7, kind: output, shape index: {}]  }
   0x1   :  { %13 = vsyncpa [#allocation6], 0 }
   0x2   :  { %14 = vsyncpa [#allocation9], 0 }
   0x3   :  { %15 = vsyncpa [#allocation4], 0  ;;  %s727_s24 = smov [#allocation5]   ;;  %s728_s26 = smov [#allocation2]  }
   0x4   :  { %s33_s25 = sshll.u32 %s727_s24, 4  ;;  %s21_s27 = sshll.u32 %s728_s26, 4  ;;  %s34_s25 = int_to_ptr.vmem [resolvable:$true] %s33_s25  ;;  %s778_s27 = int_to_ptr.vmem [resolvable:$true] %s21_s27 }
   0x5   :  { %s609_s30 = scalar_lea.hbm %s904_s1, 1024 }
   0x6   :  { %p610_p0 = scmp.ne.s32.totalorder %s904_s1, %s609_s30  ;;  %p613_p1 = scmp.lt.u32.totalorder %s609_s30, %s904_s1 }
   0x8   :  { %p615_p2 = pnand %p613_p1, %p610_p0 }
   0xa   :  { %618 = shalt.err (!%p615_p2)
}
   0xb   :  { %s619_s12 = scalar_lea.vmem %s34_s25, 1024  ;;  %p624_p4 = scmp.lt.s32.totalorder %s34_s25, %s34_s25 }
   0xc   :  { %p620_p3 = scmp.ne.s32.totalorder %s34_s25, %s619_s12  ;;  %p625_p5 = scmp.lt.s32.totalorder %s619_s12, %s619_s12 }
   0xe   :  { %p626_p6 = por %p625_p5, %p624_p4 }
  0x10   :  { %p627_p7 = pnand %p626_p6, %p620_p3 }
  0x12   :  { %630 = shalt.err (!%p627_p7)
}
  0x13   :  { %s729_s13 = smov 64   ;;  %s730_s14 = smov 4  }
  0x14   :  { %39 = dma.hbm_to_vmem [thread:$0]  %s904_s1, 1024, %s34_s25, [#allocation6], %s729_s13, %s729_s13, %s730_s14  }
  0x15   :  { %s631_s19 = scalar_lea.hbm %s903_s0, 128 }
  0x16   :  { %p632_p8 = scmp.ne.s32.totalorder %s903_s0, %s631_s19  ;;  %p635_p9 = scmp.lt.u32.totalorder %s631_s19, %s903_s0 }
  0x18   :  { %p637_p10 = pnand %p635_p9, %p632_p8 }
  0x1a   :  { %640 = shalt.err (!%p637_p10)
}
  0x1b   :  { %s641_s24 = scalar_lea.vmem %s778_s27, 128  ;;  %p646_p12 = scmp.lt.s32.totalorder %s778_s27, %s778_s27 }
  0x1c   :  { %p642_p11 = scmp.ne.s32.totalorder %s778_s27, %s641_s24  ;;  %p647_p13 = scmp.lt.s32.totalorder %s641_s24, %s641_s24 }
  0x1e   :  { %p648_p0 = por %p647_p13, %p646_p12 }
  0x20   :  { %p649_p1 = pnand %p648_p0, %p642_p11 }
  0x22   :  { %652 = shalt.err (!%p649_p1)
}
  0x23   :  { %27 = dma.hbm_to_vmem [thread:$0]  %s903_s0, 128, %s778_s27, [#allocation3], %s729_s13, %s729_s13, %s730_s14  }
  0x24   :  { %s731_s26 = smov [#allocation7]   ;;  %s732_s29 = smov [#allocation8]  }
  0x25   :  { %s47_s28 = sshll.u32 %s731_s26, 4  ;;  %s61_s30 = sshll.u32 %s732_s29, 4  ;;  %s48_s28 = int_to_ptr.vmem [resolvable:$true] %s47_s28  ;;  %s815_s30 = int_to_ptr.vmem [resolvable:$true] %s61_s30 }
  0x26   :  { %s653_s10 = scalar_lea.hbm %s906_s3, 1024 }
  0x27   :  { %p654_p2 = scmp.ne.s32.totalorder %s906_s3, %s653_s10  ;;  %p657_p3 = scmp.lt.u32.totalorder %s653_s10, %s906_s3 }
  0x29   :  { %p659_p4 = pnand %p657_p3, %p654_p2 }
  0x2b   :  { %662 = shalt.err (!%p659_p4)
}
  0x2c   :  { %s663_s0 = scalar_lea.vmem %s48_s28, 1024  ;;  %p668_p6 = scmp.lt.s32.totalorder %s48_s28, %s48_s28 }
  0x2d   :  { %p664_p5 = scmp.ne.s32.totalorder %s48_s28, %s663_s0  ;;  %p669_p7 = scmp.lt.s32.totalorder %s663_s0, %s663_s0 }
  0x2f   :  { %p670_p8 = por %p669_p7, %p668_p6 }
  0x31   :  { %p671_p9 = pnand %p670_p8, %p664_p5 }
  0x33   :  { %674 = shalt.err (!%p671_p9)
}
  0x34   :  { %53 = dma.hbm_to_vmem [thread:$0]  %s906_s3, 1024, %s48_s28, [#allocation6], %s729_s13, %s729_s13, %s730_s14  }
  0x35   :  { %s675_s20 = scalar_lea.hbm %s908_s5, 1024 }
  0x36   :  { %p676_p10 = scmp.ne.s32.totalorder %s908_s5, %s675_s20  ;;  %p679_p11 = scmp.lt.u32.totalorder %s675_s20, %s908_s5 }
  0x38   :  { %p681_p12 = pnand %p679_p11, %p676_p10 }
  0x3a   :  { %684 = shalt.err (!%p681_p12)
}
  0x3b   :  { %s685_s1 = scalar_lea.vmem %s815_s30, 1024  ;;  %p690_p0 = scmp.lt.s32.totalorder %s815_s30, %s815_s30 }
  0x3c   :  { %p686_p13 = scmp.ne.s32.totalorder %s815_s30, %s685_s1  ;;  %p691_p1 = scmp.lt.s32.totalorder %s685_s1, %s685_s1 }
  0x3e   :  { %p692_p2 = por %p691_p1, %p690_p0 }
  0x40   :  { %p693_p3 = pnand %p692_p2, %p686_p13 }
  0x42   :  { %696 = shalt.err (!%p693_p3)
}
  0x43   :  { %67 = dma.hbm_to_vmem [thread:$0]  %s908_s5, 1024, %s815_s30, [#allocation9], %s729_s13, %s729_s13, %s730_s14  }
  0x44   :  { %719 = dma.done.wait [#allocation3], 128  }
  0x45   :  { %720 = vsyncadd [#allocation3], 4294967168 }
  0x46   :  { %721 = dma.done.wait [#allocation6], 2048  }
  0x47   :  { %722 = vsyncadd [#allocation6], 4294965248 }
  0x48   :  { %723 = dma.done.wait [#allocation9], 1024  }
  0x49   :  { %724 = vsyncadd [#allocation9], 4294966272  ;;  %v733_v0 = vmov 0.0   ;;  %vm734_vm0 = vmmov 0   ;;  %v580_v1 = vld [vmem:[#allocation5] sm:$0xff]   ;;  %v581_v2 = vld [vmem:[#allocation5 + $0x8] sm:$0xff]  }
  0x4a   :  { %509 = vmatprep.subr.bf16.mxu0 %v733_v0  ;;  %525 = vmatprep.mubr.msk.bf16.mxu0 %vm734_vm0, %v733_v0  ;;  %v582_v3 = vld [vmem:[#allocation5 + $0x10] sm:$0xff]   ;;  %v589_v4 = vld [vmem:[#allocation7] sm:$0xff]   ;;  %v583_v5 = vld [vmem:[#allocation5 + $0x18] sm:$0xff]   ;;  %s735_s29 = smov [#allocation10]  }
  0x4b   :  { %529 = vmatprep.subr.bf16.mxu1 %v733_v0  ;;  %545 = vmatprep.mubr.msk.bf16.mxu1 %vm734_vm0, %v733_v0  ;;  %v590_v6 = vld [vmem:[#allocation7 + $0x8] sm:$0xff]   ;;  %v584_v7 = vld [vmem:[#allocation5 + $0x20] sm:$0xff]   ;;  %v591_v8 = vld [vmem:[#allocation7 + $0x10] sm:$0xff]   ;;  %s440_s30 = sshll.u32 %s735_s29, 4  ;;  %s441_s30 = int_to_ptr.vmem [resolvable:$true] %s440_s30 }
  0x4c   :  { %510 = vmatpush3.bf16.msra.mxu0 %v580_v1  ;;  %530 = vmatpush3.bf16.msra.mxu1 %v589_v4  ;;  %v585_v9 = vld [vmem:[#allocation5 + $0x28] sm:$0xff]   ;;  %v592_v10 = vld [vmem:[#allocation7 + $0x18] sm:$0xff]   ;;  %v586_v11 = vld [vmem:[#allocation5 + $0x30] sm:$0xff]   ;;  %p702_p5 = scmp.lt.s32.totalorder %s441_s30, %s441_s30 }
  0x4d   :  { %511 = vmatprep.subr.bf16.mxu0 %v733_v0  ;;  %531 = vmatprep.subr.bf16.mxu1 %v733_v0  ;;  %v593_v12 = vld [vmem:[#allocation7 + $0x20] sm:$0xff]   ;;  %v587_v13 = vld [vmem:[#allocation5 + $0x38] sm:$0xff]   ;;  %v594_v14 = vld [vmem:[#allocation7 + $0x28] sm:$0xff]  }
  0x4e   :  { %v588_v15 = vld [vmem:[#allocation2] sm:$0xff]   ;;  %v595_v16 = vld [vmem:[#allocation7 + $0x30] sm:$0xff]   ;;  %v597_v18 = vld [vmem:[#allocation8] sm:$0xff]  }
  0x4f   :  { %v596_v17 = vld [vmem:[#allocation7 + $0x38] sm:$0xff]   ;;  %v598_v19 = vld [vmem:[#allocation8 + $0x8] sm:$0xff]   ;;  %v599_v20 = vld [vmem:[#allocation8 + $0x10] sm:$0xff]  }
  0x50   :  { %512 = vmatpush3.bf16.msra.mxu0 %v581_v2  ;;  %532 = vmatpush3.bf16.msra.mxu1 %v590_v6  ;;  %v600_v21 = vld [vmem:[#allocation8 + $0x18] sm:$0xff]   ;;  %v601_v32 = vld [vmem:[#allocation8 + $0x20] sm:$0xff]   ;;  %v602_v33 = vld [vmem:[#allocation8 + $0x28] sm:$0xff]  }
  0x51   :  { %513 = vmatprep.subr.bf16.mxu0 %v733_v0  ;;  %533 = vmatprep.subr.bf16.mxu1 %v733_v0  ;;  %v454_v22 = vld [vmem:[%s905_s2] ss:$0 sm:$0xff]  ;;  %v603_v34 = vld [vmem:[#allocation8 + $0x30] sm:$0xff]  }
  0x52   :  { %v604_v35 = vld [vmem:[#allocation8 + $0x38] sm:$0xff]  }
  0x53   :  { %v464_v36 = vld [vmem:[%s907_s4] ss:$0 sm:$0xff]  ;;  %s697_s4 = scalar_lea.vmem %s441_s30, 256 }
  0x54   :  { %514 = vmatpush3.bf16.msra.mxu0 %v582_v3  ;;  %534 = vmatpush3.bf16.msra.mxu1 %v591_v8  ;;  %v473_v46 = vld [vmem:[%s909_s6] ss:$0 sm:$0xff]  ;;  %p698_p4 = scmp.ne.s32.totalorder %s441_s30, %s697_s4  ;;  %p703_p6 = scmp.lt.s32.totalorder %s697_s4, %s697_s4 }
  0x55   :  { %515 = vmatprep.subr.bf16.mxu0 %v733_v0  ;;  %535 = vmatprep.subr.bf16.mxu1 %v733_v0 }
  0x56   :  { %p704_p7 = por %p703_p6, %p702_p5 }
  0x58   :  { %516 = vmatpush3.bf16.msra.mxu0 %v583_v5  ;;  %536 = vmatpush3.bf16.msra.mxu1 %v592_v10  ;;  %p705_p8 = pnand %p704_p7, %p698_p4 }
  0x59   :  { %517 = vmatprep.subr.bf16.mxu0 %v733_v0  ;;  %537 = vmatprep.subr.bf16.mxu1 %v733_v0 }
  0x5c   :  { %518 = vmatpush3.bf16.msra.mxu0 %v584_v7  ;;  %538 = vmatpush3.bf16.msra.mxu1 %v593_v12 }
  0x5d   :  { %519 = vmatprep.subr.bf16.mxu0 %v733_v0  ;;  %539 = vmatprep.subr.bf16.mxu1 %v733_v0 }
  0x60   :  { %520 = vmatpush3.bf16.msra.mxu0 %v585_v9  ;;  %540 = vmatpush3.bf16.msra.mxu1 %v594_v14 }
  0x61   :  { %521 = vmatprep.subr.bf16.mxu0 %v733_v0  ;;  %541 = vmatprep.subr.bf16.mxu1 %v733_v0 }
  0x64   :  { %522 = vmatpush3.bf16.msra.mxu0 %v586_v11  ;;  %542 = vmatpush3.bf16.msra.mxu1 %v595_v16 }
  0x65   :  { %523 = vmatprep.subr.bf16.mxu0 %v733_v0  ;;  %543 = vmatprep.subr.bf16.mxu1 %v733_v0 }
  0x68   :  { %524 = vmatpush3.bf16.msra.mxu0 %v587_v13  ;;  %544 = vmatpush3.bf16.msra.mxu1 %v596_v17 }
  0x69   :  { %549 = vmatprep.subr.bf16.mxu0 %v733_v0 }
  0x6b   :  { %526 = vmatmul.mubr.bf16.vlgmr.msra.gmra.mrb[0].mxu0 %v588_v15 }
  0x6c   :  { %565 = vmatprep.mubr.msk.bf16.mxu0 %vm734_vm0, %v733_v0  ;;  %550 = vmatpush3.bf16.msra.mxu0 %v597_v18 }
  0x6d   :  { %551 = vmatprep.subr.bf16.mxu0 %v733_v0 }
  0x70   :  { %552 = vmatpush3.bf16.msra.mxu0 %v598_v19 }
  0x71   :  { %553 = vmatprep.subr.bf16.mxu0 %v733_v0 }
  0x74   :  { %554 = vmatpush3.bf16.msra.mxu0 %v599_v20 }
  0x75   :  { %555 = vmatprep.subr.bf16.mxu0 %v733_v0 }
  0x78   :  { %556 = vmatpush3.bf16.msra.mxu0 %v600_v21 }
  0x79   :  { %557 = vmatprep.subr.bf16.mxu0 %v733_v0 }
  0x7c   :  { %558 = vmatpush3.bf16.msra.mxu0 %v601_v32 }
  0x7d   :  { %559 = vmatprep.subr.bf16.mxu0 %v733_v0 }
  0x80   :  { %560 = vmatpush3.bf16.msra.mxu0 %v602_v33 }
  0x81   :  { %561 = vmatprep.subr.bf16.mxu0 %v733_v0 }
  0x84   :  { %562 = vmatpush3.bf16.msra.mxu0 %v603_v34 }
  0x85   :  { %563 = vmatprep.subr.bf16.mxu0 %v733_v0 }
  0x88   :  { %564 = vmatpush3.bf16.msra.mxu0 %v604_v35 }
 0x13e   :  { %v196_v23 = vpop.f32.mrb[0].mxu0 }
 0x13f   :  { %v197_v24 = vadd.f32 %v454_v22, %v196_v23  ;;  %v527_v25 = vpop.f32.mrb[1].mxu0 }
 0x140   :  { %v199_v26 = vpop.f32.mrb[2].mxu0 }
 0x141   :  { %v200_v27 = vadd.f32 %v454_v22, %v199_v26  ;;  %v528_v28 = vpop.f32.mrb[3].mxu0  ;;  %v203_v29 = vmax.f32 %v197_v24, 0.0 }
 0x143   :  { %v204_v30 = vmax.f32 %v200_v27, 0.0 }
 0x145   :  { %v205_v31 = vpack.c.bf16 %v204_v30, %v203_v29 }
 0x147   :  { %546 = vmatmul.mubr.bf16.vlgmr.msra.gmra.mrb[0].mxu1 %v205_v31 }
 0x21a   :  { %v311_v37 = vpop.f32.mrb[0].mxu1 }
 0x21b   :  { %v312_v38 = vadd.f32 %v464_v36, %v311_v37  ;;  %v547_v39 = vpop.f32.mrb[1].mxu1 }
 0x21c   :  { %v314_v40 = vpop.f32.mrb[2].mxu1 }
 0x21d   :  { %v315_v41 = vadd.f32 %v464_v36, %v314_v40  ;;  %v548_v42 = vpop.f32.mrb[3].mxu1  ;;  %605 = vtanh.f32 %v312_v38 }
 0x21f   :  { %607 = vtanh.f32 %v315_v41 }
 0x227   :  { %v606_v43 = vpop.eup %605 }
 0x229   :  { %v608_v44 = vpop.eup %607 }
 0x22a   :  { %v320_v45 = vpack.c.bf16 %v608_v44, %v606_v43 }
 0x22c   :  { %566 = vmatmul.mubr.bf16.vlgmr.msra.gmra.mrb[4].mxu0 %v320_v45 }
 0x2ff   :  { %v426_v47 = vpop.f32.mrb[4].mxu0 }
 0x300   :  { %v427_v48 = vadd.f32 %v473_v46, %v426_v47  ;;  %v567_v49 = vpop.f32.mrb[5].mxu0 }
 0x301   :  { %v429_v50 = vpop.f32.mrb[6].mxu0 }
 0x302   :  { %433 = vst [vmem:[#allocation10] sm:$0xff] %v427_v48  ;;  %v430_v51 = vadd.f32 %v473_v46, %v429_v50  ;;  %v568_v52 = vpop.f32.mrb[7].mxu0 }
 0x304   :  { %434 = vst [vmem:[#allocation10 + $0x8] sm:$0xff] %v430_v51 }
 0x305   :  { %708 = shalt.err (!%p705_p8)
}
 0x306   :  { %s709_s9 = scalar_lea.hbm %s910_s7, 256 }
 0x307   :  { %p710_p9 = scmp.ne.s32.totalorder %s910_s7, %s709_s9  ;;  %p713_p10 = scmp.lt.u32.totalorder %s709_s9, %s910_s7 }
 0x309   :  { %p715_p11 = pnand %p713_p10, %p710_p9 }
 0x30b   :  { %718 = shalt.err (!%p715_p11)
}
 0x30c   :  { %s736_s16 = smov 128   ;;  %s737_s0 = smov 8  }
 0x30d   :  { %446 = dma.vmem_to_hbm [thread:$0]  %s441_s30, 256, %s910_s7, [#allocation4], %s736_s16, %s736_s16, %s737_s0  }
 0x30e   :  { %725 = dma.done.wait [#allocation4], 256  }
 0x30f   :  { %726 = vsyncadd [#allocation4], 4294967040 }
 0x310   :  { %450 = vsyncpa [#allocation3], 1 }
 0x311   :  { %451 = vsyncpa [#allocation6], 1 }
 0x312   :  { %452 = vsyncpa [#allocation9], 1 }
 0x313   :  { %453 = vsyncpa [#allocation4], 1 }

</bundles_post_ra>
